<compile_context>
chip_gen: v7x
topology: tpu7x:2x2x1
jax: 0.10.0
libtpu: 0.0.40
codegen_flags: <defaults>
</compile_context>

<pallas_src>
import jax
import jax.numpy as jnp
from jax.experimental import pallas as pl
from jax.experimental.pallas import tpu as pltpu

LANE = 128  # TPU lane width (last-dim vreg extent)


def _round_up(x, m):
    return ((x + m - 1) // m) * m


def _vmem_capacity_bytes():
    """Physical VMEM per core; conservative 64 MiB (v7x) fallback."""
    try:
        return int(pltpu.get_tpu_info().vmem_capacity_bytes)
    except Exception:
        return 64 * 1024 * 1024


def tenny_kernel(x_ref,
                 w1_ref, b1_ref,
                 w2_ref, b2_ref,
                 w3_ref, b3_ref,
                 w4_ref, b4_ref,
                 w5_ref, b5_ref,
                 o_ref):
    """Fused 5-layer MLP forward: fc1..fc4 with ReLU, fc5 linear."""

    def layer(h, w_ref, b_ref, relu):
        w = w_ref[...]
        if h.dtype != w.dtype:           # no-op cast on the default f32 path
            h = h.astype(w.dtype)
        y = jnp.dot(h, w, preferred_element_type=jnp.float32)
        # Elementwise (bias add / ReLU) stays in the compute dtype: f32 by
        # default, bf16 only when explicitly requested (v6e/v7x bf16 VPU).
        y = y.astype(w.dtype) + b_ref[...]
        return jnp.maximum(y, 0.0) if relu else y

    h = x_ref[...]
    h = layer(h, w1_ref, b1_ref, True)
    h = layer(h, w2_ref, b2_ref, True)
    # nn.Dropout(0.5) -> identity in eval mode
    h = layer(h, w3_ref, b3_ref, True)
    h = layer(h, w4_ref, b4_ref, True)
    o_ref[...] = layer(h, w5_ref, b5_ref, False).astype(o_ref.dtype)


def tenny_forward(x, params, *, bm=None, matmul_dtype=jnp.float32):
    """x: [B, input_size]. params: w_i as [in, out], b_i as [out]. Returns [B, out]."""
    B, in_size = x.shape
    hid = params["w1"].shape[1]
    out_size = params["w5"].shape[1]

    w_dt = jnp.dtype(matmul_dtype)
    act_dt = w_dt  # compute/elementwise dtype follows the matmul operand dtype

    # ---- lane-pad hidden / output feature dims to 128 (zero columns/rows) ----
    hid_p = _round_up(hid, LANE)
    out_p = _round_up(out_size, LANE)

    def pad_w(w, rows, cols):
        return jnp.pad(w.astype(w_dt),
                       ((0, rows - w.shape[0]), (0, cols - w.shape[1])))

    def pad_b(b, cols):
        return jnp.pad(b.astype(act_dt), (0, cols - b.shape[0])).reshape(1, cols)

    layer_shapes = [(in_size, hid_p), (hid_p, hid_p), (hid_p, hid_p),
                    (hid_p, hid_p), (hid_p, out_p)]
    ws = [pad_w(params["w1"], in_size, hid_p),
          pad_w(params["w2"], hid_p, hid_p),
          pad_w(params["w3"], hid_p, hid_p),
          pad_w(params["w4"], hid_p, hid_p),
          pad_w(params["w5"], hid_p, out_p)]
    bs = [pad_b(params["b1"], hid_p),
          pad_b(params["b2"], hid_p),
          pad_b(params["b3"], hid_p),
          pad_b(params["b4"], hid_p),
          pad_b(params["b5"], out_p)]

    if x.dtype != w_dt:
        x = x.astype(w_dt)  # bf16 path: halve input DMA bytes

    # ---- VMEM accounting: resident weights + batch-dependent tiles --------
    vmem_cap = _vmem_capacity_bytes()
    weight_bytes = (sum(r * c for r, c in layer_shapes) * w_dt.itemsize
                    + sum(c for _, c in layer_shapes) * act_dt.itemsize)
    per_row = (2 * in_size * x.dtype.itemsize        # double-buffered x tile
               + 2 * out_p * 4                       # double-buffered f32 out tile
               + 3 * hid_p * act_dt.itemsize)        # live intermediates

    if bm is None:
        budget = max(vmem_cap // 2 - weight_bytes, 1 << 20)
        cap = max(8, min(4096, (budget // max(per_row, 1)) // 8 * 8))
        bm = min(cap, _round_up(B, 8))
    bm = max(8, _round_up(bm, 8))
    grid = (pl.cdiv(B, bm),)  # partial last block masked by the pipeline

    # Grid-invariant weights/biases: constant index_map + single-buffered so
    # each is resident once in VMEM instead of double-buffered.
    weight_args, weight_specs = [], []
    for (wi, wo), w, b in zip(layer_shapes, ws, bs):
        weight_args += [w, b]
        weight_specs += [
            pl.BlockSpec((wi, wo), lambda m: (0, 0),
                         pipeline_mode=pl.Buffered(1)),
            pl.BlockSpec((1, wo), lambda m: (0, 0),
                         pipeline_mode=pl.Buffered(1)),
        ]

    est = weight_bytes + bm * per_row + (1 << 20)
    vmem_limit = int(min(max(2 * est, 16 << 20), int(0.8 * vmem_cap)))

    out = pl.pallas_call(
        tenny_kernel,
        out_shape=jax.ShapeDtypeStruct((B, out_p), jnp.float32),
        grid_spec=pltpu.PrefetchScalarGridSpec(
            num_scalar_prefetch=0,
            grid=grid,
            in_specs=[pl.BlockSpec((bm, in_size), lambda m: (m, 0))]
                     + weight_specs,
            out_specs=pl.BlockSpec((bm, out_p), lambda m: (m, 0)),
        ),
        compiler_params=pltpu.CompilerParams(
            dimension_semantics=("parallel",),
            vmem_limit_bytes=vmem_limit,
        ),
    )(x, *weight_args)

    # Drop the zero lane-padding columns (rows are exact: no batch padding).
    return out[:, :out_size]


def init_params(key, input_size, hidden_size, output_size):
    """Deterministic init mimicking PyTorch nn.Linear default
    (uniform(-1/sqrt(fan_in), 1/sqrt(fan_in))). Weights stored as [in, out]."""
    dims = [(input_size, hidden_size),
            (hidden_size, hidden_size),
            (hidden_size, hidden_size),
            (hidden_size, hidden_size),
            (hidden_size, output_size)]
    params = {}
    for i, (fan_in, fan_out) in enumerate(dims, start=1):
        key, kw, kb = jax.random.split(key, 3)
        bound = 1.0 / jnp.sqrt(jnp.float32(fan_in))
        params[f"w{i}"] = jax.random.uniform(
            kw, (fan_in, fan_out), jnp.float32, -bound, bound)
        params[f"b{i}"] = jax.random.uniform(
            kb, (fan_out,), jnp.float32, -bound, bound)
    return params


def tenny_reference(x, params):
    """Pure-JAX reference of the same forward (eval-mode dropout)."""
    h = jax.nn.relu(x @ params["w1"] + params["b1"])
    h = jax.nn.relu(h @ params["w2"] + params["b2"])
    h = jax.nn.relu(h @ params["w3"] + params["b3"])
    h = jax.nn.relu(h @ params["w4"] + params["b4"])
    return h @ params["w5"] + params["b5"]


if __name__ == "__main__":
    # Small shapes consistent with the module: a batch of feature rows.
    batch = 20          # not a multiple of 8 -> exercises the partial-block path
    input_size = 16     # stands in for train_dataset.features.shape[1]
    hidden_size = 30    # as in the module
    output_size = 1

    key = jax.random.PRNGKey(0)
    key, kx = jax.random.split(key)
    x = jax.random.normal(kx, (batch, input_size), jnp.float32)
    params = init_params(key, input_size, hidden_size, output_size)

    ref = tenny_reference(x, params)

    # f32 path, single grid step (tiny batch -> no forced split).
    out = jax.block_until_ready(tenny_forward(x, params))
    assert out.shape == (batch, output_size)
    assert jnp.allclose(out, ref, atol=1e-5, rtol=1e-5), "f32 mismatch vs reference"

    # Multi-step grid + masked partial last block (bm forced small): checks the
    # no-batch-pad path with B % bm != 0.
    key, kx2 = jax.random.split(key)
    x2 = jax.random.normal(kx2, (300, input_size), jnp.float32)
    ref2 = tenny_reference(x2, params)
    out2 = jax.block_until_ready(tenny_forward(x2, params, bm=128))
    assert out2.shape == (300, output_size)
    assert jnp.allclose(out2, ref2, atol=1e-5, rtol=1e-5), "tiled path mismatch"

    # Opt-in bf16 matmul/elementwise path (f32 MXU accumulation): the MXU/HBM
    # lever for large hidden sizes on v6e/v7x; loose tolerance for the dtype.
    out_bf16 = jax.block_until_ready(
        tenny_forward(x, params, matmul_dtype=jnp.bfloat16))
    assert out_bf16.shape == (batch, output_size)
    assert jnp.allclose(out_bf16, ref, atol=1e-1, rtol=1e-1), "bf16 path mismatch"

    print("KERNEL_OK")
</pallas_src>

<mosaic_0001>
module attributes {stable_mosaic.version = 11 : i64} {
  func.func @tenny_kernel(%arg0: i32, %arg1: memref<24x16xf32, #tpu.memory_space<vmem>>, %arg2: memref<16x128xf32, #tpu.memory_space<vmem>>, %arg3: memref<1x128xf32, #tpu.memory_space<vmem>>, %arg4: memref<128x128xf32, #tpu.memory_space<vmem>>, %arg5: memref<1x128xf32, #tpu.memory_space<vmem>>, %arg6: memref<128x128xf32, #tpu.memory_space<vmem>>, %arg7: memref<1x128xf32, #tpu.memory_space<vmem>>, %arg8: memref<128x128xf32, #tpu.memory_space<vmem>>, %arg9: memref<1x128xf32, #tpu.memory_space<vmem>>, %arg10: memref<128x128xf32, #tpu.memory_space<vmem>>, %arg11: memref<1x128xf32, #tpu.memory_space<vmem>>, %arg12: memref<24x128xf32, #tpu.memory_space<vmem>>) attributes {dimension_semantics = [#tpu.dimension_semantics<parallel>], iteration_bounds = array<i64: 1>, scalar_prefetch = 0 : i64, scratch_operands = 0 : i64, tpu.core_type = #tpu.core_type<tc>, window_params = [{transform_indices = @transform_0, window_bounds = array<i64: 24, 16>}, {pipeline_mode = #tpu.pipeline_mode<synchronous>, transform_indices = @transform_1, window_bounds = array<i64: 16, 128>}, {pipeline_mode = #tpu.pipeline_mode<synchronous>, transform_indices = @transform_2, window_bounds = array<i64: 1, 128>}, {pipeline_mode = #tpu.pipeline_mode<synchronous>, transform_indices = @transform_3, window_bounds = array<i64: 128, 128>}, {pipeline_mode = #tpu.pipeline_mode<synchronous>, transform_indices = @transform_4, window_bounds = array<i64: 1, 128>}, {pipeline_mode = #tpu.pipeline_mode<synchronous>, transform_indices = @transform_5, window_bounds = array<i64: 128, 128>}, {pipeline_mode = #tpu.pipeline_mode<synchronous>, transform_indices = @transform_6, window_bounds = array<i64: 1, 128>}, {pipeline_mode = #tpu.pipeline_mode<synchronous>, transform_indices = @transform_7, window_bounds = array<i64: 128, 128>}, {pipeline_mode = #tpu.pipeline_mode<synchronous>, transform_indices = @transform_8, window_bounds = array<i64: 1, 128>}, {pipeline_mode = #tpu.pipeline_mode<synchronous>, transform_indices = @transform_9, window_bounds = array<i64: 128, 128>}, {pipeline_mode = #tpu.pipeline_mode<synchronous>, transform_indices = @transform_10, window_bounds = array<i64: 1, 128>}, {transform_indices = @transform_11, window_bounds = array<i64: 24, 128>}]} {
    %c0 = arith.constant 0 : index
    %c0_0 = arith.constant 0 : index
    %0 = vector.load %arg1[%c0, %c0_0] : memref<24x16xf32, #tpu.memory_space<vmem>>, vector<24x16xf32>
    %c0_1 = arith.constant 0 : index
    %c0_2 = arith.constant 0 : index
    %1 = vector.load %arg2[%c0_1, %c0_2] : memref<16x128xf32, #tpu.memory_space<vmem>>, vector<16x128xf32>
    %cst = arith.constant dense<0.000000e+00> : vector<24x128xf32>
    %2 = tpu.matmul %0, %1, %cst {dimension_numbers = #tpu.dot_dimension_numbers<[1], [0], [0], [1], [0, 0, 1, 1], [], []>} : vector<24x16xf32>, vector<16x128xf32>, vector<24x128xf32> -> vector<24x128xf32>
    %c0_3 = arith.constant 0 : index
    %c0_4 = arith.constant 0 : index
    %3 = vector.load %arg3[%c0_3, %c0_4] : memref<1x128xf32, #tpu.memory_space<vmem>>, vector<1x128xf32>
    %4 = vector.broadcast %3 : vector<1x128xf32> to vector<24x128xf32>
    %5 = arith.addf %2, %4 : vector<24x128xf32>
    %cst_5 = arith.constant 0.000000e+00 : f32
    %6 = vector.broadcast %cst_5 : f32 to vector<24x128xf32>
    %7 = arith.maximumf %5, %6 : vector<24x128xf32>
    %c0_6 = arith.constant 0 : index
    %c0_7 = arith.constant 0 : index
    %8 = vector.load %arg4[%c0_6, %c0_7] : memref<128x128xf32, #tpu.memory_space<vmem>>, vector<128x128xf32>
    %cst_8 = arith.constant dense<0.000000e+00> : vector<24x128xf32>
    %9 = tpu.matmul %7, %8, %cst_8 {dimension_numbers = #tpu.dot_dimension_numbers<[1], [0], [0], [1], [0, 0, 1, 1], [], []>} : vector<24x128xf32>, vector<128x128xf32>, vector<24x128xf32> -> vector<24x128xf32>
    %c0_9 = arith.constant 0 : index
    %c0_10 = arith.constant 0 : index
    %10 = vector.load %arg5[%c0_9, %c0_10] : memref<1x128xf32, #tpu.memory_space<vmem>>, vector<1x128xf32>
    %11 = vector.broadcast %10 : vector<1x128xf32> to vector<24x128xf32>
    %12 = arith.addf %9, %11 : vector<24x128xf32>
    %cst_11 = arith.constant 0.000000e+00 : f32
    %13 = vector.broadcast %cst_11 : f32 to vector<24x128xf32>
    %14 = arith.maximumf %12, %13 : vector<24x128xf32>
    %c0_12 = arith.constant 0 : index
    %c0_13 = arith.constant 0 : index
    %15 = vector.load %arg6[%c0_12, %c0_13] : memref<128x128xf32, #tpu.memory_space<vmem>>, vector<128x128xf32>
    %cst_14 = arith.constant dense<0.000000e+00> : vector<24x128xf32>
    %16 = tpu.matmul %14, %15, %cst_14 {dimension_numbers = #tpu.dot_dimension_numbers<[1], [0], [0], [1], [0, 0, 1, 1], [], []>} : vector<24x128xf32>, vector<128x128xf32>, vector<24x128xf32> -> vector<24x128xf32>
    %c0_15 = arith.constant 0 : index
    %c0_16 = arith.constant 0 : index
    %17 = vector.load %arg7[%c0_15, %c0_16] : memref<1x128xf32, #tpu.memory_space<vmem>>, vector<1x128xf32>
    %18 = vector.broadcast %17 : vector<1x128xf32> to vector<24x128xf32>
    %19 = arith.addf %16, %18 : vector<24x128xf32>
    %cst_17 = arith.constant 0.000000e+00 : f32
    %20 = vector.broadcast %cst_17 : f32 to vector<24x128xf32>
    %21 = arith.maximumf %19, %20 : vector<24x128xf32>
    %c0_18 = arith.constant 0 : index
    %c0_19 = arith.constant 0 : index
    %22 = vector.load %arg8[%c0_18, %c0_19] : memref<128x128xf32, #tpu.memory_space<vmem>>, vector<128x128xf32>
    %cst_20 = arith.constant dense<0.000000e+00> : vector<24x128xf32>
    %23 = tpu.matmul %21, %22, %cst_20 {dimension_numbers = #tpu.dot_dimension_numbers<[1], [0], [0], [1], [0, 0, 1, 1], [], []>} : vector<24x128xf32>, vector<128x128xf32>, vector<24x128xf32> -> vector<24x128xf32>
    %c0_21 = arith.constant 0 : index
    %c0_22 = arith.constant 0 : index
    %24 = vector.load %arg9[%c0_21, %c0_22] : memref<1x128xf32, #tpu.memory_space<vmem>>, vector<1x128xf32>
    %25 = vector.broadcast %24 : vector<1x128xf32> to vector<24x128xf32>
    %26 = arith.addf %23, %25 : vector<24x128xf32>
    %cst_23 = arith.constant 0.000000e+00 : f32
    %27 = vector.broadcast %cst_23 : f32 to vector<24x128xf32>
    %28 = arith.maximumf %26, %27 : vector<24x128xf32>
    %c0_24 = arith.constant 0 : index
    %c0_25 = arith.constant 0 : index
    %29 = vector.load %arg10[%c0_24, %c0_25] : memref<128x128xf32, #tpu.memory_space<vmem>>, vector<128x128xf32>
    %cst_26 = arith.constant dense<0.000000e+00> : vector<24x128xf32>
    %30 = tpu.matmul %28, %29, %cst_26 {dimension_numbers = #tpu.dot_dimension_numbers<[1], [0], [0], [1], [0, 0, 1, 1], [], []>} : vector<24x128xf32>, vector<128x128xf32>, vector<24x128xf32> -> vector<24x128xf32>
    %c0_27 = arith.constant 0 : index
    %c0_28 = arith.constant 0 : index
    %31 = vector.load %arg11[%c0_27, %c0_28] : memref<1x128xf32, #tpu.memory_space<vmem>>, vector<1x128xf32>
    %32 = vector.broadcast %31 : vector<1x128xf32> to vector<24x128xf32>
    %33 = arith.addf %30, %32 : vector<24x128xf32>
    %c0_29 = arith.constant 0 : index
    %c0_30 = arith.constant 0 : index
    %34 = vector.load %arg12[%c0_29, %c0_30] : memref<24x128xf32, #tpu.memory_space<vmem>>, vector<24x128xf32>
    tpu.vector_store %arg12[%c0_29, %c0_30], %33 {strides = array<i32>} : memref<24x128xf32, #tpu.memory_space<vmem>>, vector<24x128xf32>,
    return
  }
  func.func @transform_0(%arg0: i32) -> (i32, i32) {
    %c0_i32 = arith.constant 0 : i32
    %c0_i32_0 = arith.constant 0 : i32
    return %arg0, %c0_i32 : i32, i32
  }
  func.func @transform_1(%arg0: i32) -> (i32, i32) {
    %c0_i32 = arith.constant 0 : i32
    %c0_i32_0 = arith.constant 0 : i32
    %c0_i32_1 = arith.constant 0 : i32
    return %c0_i32, %c0_i32_0 : i32, i32
  }
  func.func @transform_2(%arg0: i32) -> (i32, i32) {
    %c0_i32 = arith.constant 0 : i32
    %c0_i32_0 = arith.constant 0 : i32
    %c0_i32_1 = arith.constant 0 : i32
    return %c0_i32, %c0_i32_0 : i32, i32
  }
  func.func @transform_3(%arg0: i32) -> (i32, i32) {
    %c0_i32 = arith.constant 0 : i32
    %c0_i32_0 = arith.constant 0 : i32
    %c0_i32_1 = arith.constant 0 : i32
    return %c0_i32, %c0_i32_0 : i32, i32
  }
  func.func @transform_4(%arg0: i32) -> (i32, i32) {
    %c0_i32 = arith.constant 0 : i32
    %c0_i32_0 = arith.constant 0 : i32
    %c0_i32_1 = arith.constant 0 : i32
    return %c0_i32, %c0_i32_0 : i32, i32
  }
  func.func @transform_5(%arg0: i32) -> (i32, i32) {
    %c0_i32 = arith.constant 0 : i32
    %c0_i32_0 = arith.constant 0 : i32
    %c0_i32_1 = arith.constant 0 : i32
    return %c0_i32, %c0_i32_0 : i32, i32
  }
  func.func @transform_6(%arg0: i32) -> (i32, i32) {
    %c0_i32 = arith.constant 0 : i32
    %c0_i32_0 = arith.constant 0 : i32
    %c0_i32_1 = arith.constant 0 : i32
    return %c0_i32, %c0_i32_0 : i32, i32
  }
  func.func @transform_7(%arg0: i32) -> (i32, i32) {
    %c0_i32 = arith.constant 0 : i32
    %c0_i32_0 = arith.constant 0 : i32
    %c0_i32_1 = arith.constant 0 : i32
    return %c0_i32, %c0_i32_0 : i32, i32
  }
  func.func @transform_8(%arg0: i32) -> (i32, i32) {
    %c0_i32 = arith.constant 0 : i32
    %c0_i32_0 = arith.constant 0 : i32
    %c0_i32_1 = arith.constant 0 : i32
    return %c0_i32, %c0_i32_0 : i32, i32
  }
  func.func @transform_9(%arg0: i32) -> (i32, i32) {
    %c0_i32 = arith.constant 0 : i32
    %c0_i32_0 = arith.constant 0 : i32
    %c0_i32_1 = arith.constant 0 : i32
    return %c0_i32, %c0_i32_0 : i32, i32
  }
  func.func @transform_10(%arg0: i32) -> (i32, i32) {
    %c0_i32 = arith.constant 0 : i32
    %c0_i32_0 = arith.constant 0 : i32
    %c0_i32_1 = arith.constant 0 : i32
    return %c0_i32, %c0_i32_0 : i32, i32
  }
  func.func @transform_11(%arg0: i32) -> (i32, i32) {
    %c0_i32 = arith.constant 0 : i32
    %c0_i32_0 = arith.constant 0 : i32
    return %arg0, %c0_i32 : i32, i32
  }
}

</mosaic_0001>

<bundles_post_ra>
// kernel: tpu_custom_call.1
= control target key start
LH: loop header
LB: loop body
LE: loop exit
PB: predicated region body
PF: predicated region fallthrough
CT: control target
= control target key end

     0   :  { %16 = vsyncpa [#allocation3], 0  ;;  %s1390_s0 = inlined_call_operand.vmem [shape: f32[20,16], index: 0, kind: input, shape index: {}]   ;;  %s1391_s1 = inlined_call_operand.vmem [shape: f32[16,128], index: 1, kind: input, shape index: {}]   ;;  %s1392_s2 = inlined_call_operand.vmem [shape: f32[1,128], index: 2, kind: input, shape index: {}]   ;;  %s1393_s3 = inlined_call_operand.hbm [shape: f32[128,128], index: 3, kind: input, shape index: {}]   ;;  %s1394_s4 = inlined_call_operand.vmem [shape: f32[1,128], index: 4, kind: input, shape index: {}]   ;;  %s1395_s5 = inlined_call_operand.hbm [shape: f32[128,128], index: 5, kind: input, shape index: {}]   ;;  %s1396_s6 = inlined_call_operand.vmem [shape: f32[1,128], index: 6, kind: input, shape index: {}]   ;;  %s1397_s7 = inlined_call_operand.hbm [shape: f32[128,128], index: 7, kind: input, shape index: {}]   ;;  %s1398_s8 = inlined_call_operand.vmem [shape: f32[1,128], index: 8, kind: input, shape index: {}]   ;;  %s1399_s9 = inlined_call_operand.hbm [shape: f32[128,128], index: 9, kind: input, shape index: {}]   ;;  %s1400_s10 = inlined_call_operand.vmem [shape: f32[1,128], index: 10, kind: input, shape index: {}]   ;;  %s1401_s11 = inlined_call_operand.hbm [shape: f32[20,128], index: 11, kind: output, shape index: {}]  }
   0x1   :  { %17 = vsyncpa [#allocation6], 0 }
   0x2   :  { %18 = vsyncpa [#allocation9], 0 }
   0x3   :  { %19 = vsyncpa [#allocation4], 0  ;;  %s1135_s17 = smov [#allocation5]   ;;  %s1136_s19 = smov [#allocation2]  }
   0x4   :  { %s45_s18 = sshll.u32 %s1135_s17, 4  ;;  %s31_s20 = sshll.u32 %s1136_s19, 4  ;;  %s46_s18 = int_to_ptr.vmem [resolvable:$true] %s45_s18  ;;  %s1205_s20 = int_to_ptr.vmem [resolvable:$true] %s31_s20 }
   0x5   :  { %s1017_s23 = scalar_lea.hbm %s1395_s5, 2048 }
   0x6   :  { %p1018_p0 = scmp.ne.s32.totalorder %s1395_s5, %s1017_s23  ;;  %p1021_p1 = scmp.lt.u32.totalorder %s1017_s23, %s1395_s5 }
   0x8   :  { %p1023_p2 = pnand %p1021_p1, %p1018_p0 }
   0xa   :  { %1026 = shalt.err (!%p1023_p2)
}
   0xb   :  { %s1027_s28 = scalar_lea.vmem %s46_s18, 2048  ;;  %p1032_p4 = scmp.lt.s32.totalorder %s46_s18, %s46_s18 }
   0xc   :  { %p1028_p3 = scmp.ne.s32.totalorder %s46_s18, %s1027_s28  ;;  %p1033_p5 = scmp.lt.s32.totalorder %s1027_s28, %s1027_s28 }
   0xe   :  { %p1034_p6 = por %p1033_p5, %p1032_p4 }
  0x10   :  { %p1035_p7 = pnand %p1034_p6, %p1028_p3 }
  0x12   :  { %1038 = shalt.err (!%p1035_p7)
}
  0x13   :  { %s1137_s29 = smov 128   ;;  %s1138_s30 = smov 8  }
  0x14   :  { %51 = dma.hbm_to_vmem [thread:$0]  %s1395_s5, 2048, %s46_s18, [#allocation6], %s1137_s29, %s1137_s29, %s1138_s30  }
  0x15   :  { %s1039_s16 = scalar_lea.hbm %s1393_s3, 2048 }
  0x16   :  { %p1040_p8 = scmp.ne.s32.totalorder %s1393_s3, %s1039_s16  ;;  %p1043_p9 = scmp.lt.u32.totalorder %s1039_s16, %s1393_s3 }
  0x18   :  { %p1045_p10 = pnand %p1043_p9, %p1040_p8 }
  0x1a   :  { %1048 = shalt.err (!%p1045_p10)
}
  0x1b   :  { %s1049_s23 = scalar_lea.vmem %s1205_s20, 2048  ;;  %p1054_p12 = scmp.lt.s32.totalorder %s1205_s20, %s1205_s20 }
  0x1c   :  { %p1050_p11 = scmp.ne.s32.totalorder %s1205_s20, %s1049_s23  ;;  %p1055_p13 = scmp.lt.s32.totalorder %s1049_s23, %s1049_s23 }
  0x1e   :  { %p1056_p0 = por %p1055_p13, %p1054_p12 }
  0x20   :  { %p1057_p1 = pnand %p1056_p0, %p1050_p11 }
  0x22   :  { %1060 = shalt.err (!%p1057_p1)
}
  0x23   :  { %37 = dma.hbm_to_vmem [thread:$0]  %s1393_s3, 2048, %s1205_s20, [#allocation3], %s1137_s29, %s1137_s29, %s1138_s30  }
  0x24   :  { %s1139_s24 = smov [#allocation7]   ;;  %s1140_s26 = smov [#allocation8]  }
  0x25   :  { %s59_s25 = sshll.u32 %s1139_s24, 4  ;;  %s73_s27 = sshll.u32 %s1140_s26, 4  ;;  %s60_s25 = int_to_ptr.vmem [resolvable:$true] %s59_s25  ;;  %s1242_s27 = int_to_ptr.vmem [resolvable:$true] %s73_s27 }
  0x26   :  { %s1061_s13 = scalar_lea.hbm %s1397_s7, 2048 }
  0x27   :  { %p1062_p2 = scmp.ne.s32.totalorder %s1397_s7, %s1061_s13  ;;  %p1065_p3 = scmp.lt.u32.totalorder %s1061_s13, %s1397_s7 }
  0x29   :  { %p1067_p4 = pnand %p1065_p3, %p1062_p2 }
  0x2b   :  { %1070 = shalt.err (!%p1067_p4)
}
  0x2c   :  { %s1071_s3 = scalar_lea.vmem %s60_s25, 2048  ;;  %p1076_p6 = scmp.lt.s32.totalorder %s60_s25, %s60_s25 }
  0x2d   :  { %p1072_p5 = scmp.ne.s32.totalorder %s60_s25, %s1071_s3  ;;  %p1077_p7 = scmp.lt.s32.totalorder %s1071_s3, %s1071_s3 }
  0x2f   :  { %p1078_p8 = por %p1077_p7, %p1076_p6 }
  0x31   :  { %p1079_p9 = pnand %p1078_p8, %p1072_p5 }
  0x33   :  { %1082 = shalt.err (!%p1079_p9)
}
  0x34   :  { %65 = dma.hbm_to_vmem [thread:$0]  %s1397_s7, 2048, %s60_s25, [#allocation6], %s1137_s29, %s1137_s29, %s1138_s30  }
  0x35   :  { %s1083_s23 = scalar_lea.hbm %s1399_s9, 2048 }
  0x36   :  { %p1084_p10 = scmp.ne.s32.totalorder %s1399_s9, %s1083_s23  ;;  %p1087_p11 = scmp.lt.u32.totalorder %s1083_s23, %s1399_s9 }
  0x38   :  { %p1089_p12 = pnand %p1087_p11, %p1084_p10 }
  0x3a   :  { %1092 = shalt.err (!%p1089_p12)
}
  0x3b   :  { %s1093_s28 = scalar_lea.vmem %s1242_s27, 2048  ;;  %p1098_p0 = scmp.lt.s32.totalorder %s1242_s27, %s1242_s27 }
  0x3c   :  { %p1094_p13 = scmp.ne.s32.totalorder %s1242_s27, %s1093_s28  ;;  %p1099_p1 = scmp.lt.s32.totalorder %s1093_s28, %s1093_s28 }
  0x3e   :  { %p1100_p2 = por %p1099_p1, %p1098_p0 }
  0x40   :  { %p1101_p3 = pnand %p1100_p2, %p1094_p13 }
  0x42   :  { %1104 = shalt.err (!%p1101_p3)
}
  0x43   :  { %79 = dma.hbm_to_vmem [thread:$0]  %s1399_s9, 2048, %s1242_s27, [#allocation9], %s1137_s29, %s1137_s29, %s1138_s30  }
  0x44   :  { %1127 = dma.done.wait [#allocation3], 2048  }
  0x45   :  { %1128 = vsyncadd [#allocation3], 4294965248 }
  0x46   :  { %1129 = dma.done.wait [#allocation6], 4096  }
  0x47   :  { %1130 = vsyncadd [#allocation6], 4294963200 }
  0x48   :  { %1131 = dma.done.wait [#allocation9], 2048  }
  0x49   :  { %1132 = vsyncadd [#allocation9], 4294965248  ;;  %v1141_v0 = vmov 0.0|0.0   ;;  %vm1142_vm0 = vmmov 0   ;;  %v1143_v1 = vmov 0.0   ;;  %v97_v2 = vld [vmem:[%s1391_s1] sm:$0xff] }
  0x4a   :  { %908 = vmatprep.subr.bf16.mxu0 %v1141_v0  ;;  %735 = vmatprep.mubr.msk.f32.mxu0 %vm1142_vm0, %v1143_v1  ;;  %v98_v3 = vld [vmem:[%s1391_s1 + $0x8] sm:$0xff]  ;;  %v200_v6 = vld [vmem:[#allocation2 + $0x8] sm:$0xff]  ;;  %v201_v7 = vld [vmem:[#allocation2 + $0x10] sm:$0xff]  ;;  %vm106_vm1 = vcmask 130048   ;;  %s1144_s5 = smov [#allocation10]  }
  0x4b   :  { %911 = vmatprep.subr.bf16.mxu1 %v1141_v0  ;;  %776 = vmatprep.mubr.msk.f32.mxu1 %vm1142_vm0, %v1143_v1  ;;  %v909_v4 = vpack.c.bf16 %v98_v3, %v97_v2  ;;  %v199_v5 = vld [vmem:[#allocation2] sm:$0xff]  ;;  %v202_v8 = vld [vmem:[#allocation2 + $0x18] sm:$0xff]  ;;  %v204_v13 = vld [vmem:[#allocation2 + $0x28] sm:$0xff]  ;;  %s628_s18 = sshll.u32 %s1144_s5, 4  ;;  %s629_s18 = int_to_ptr.vmem [resolvable:$true] %s628_s18 }
  0x4c   :  { %v94_v9 = vld [vmem:[%s1390_s0] sm:$0xff]  ;;  %v912_v10 = vpack.c.bf16 %v200_v6, %v199_v5  ;;  %v915_v11 = vpack.c.bf16 %v202_v8, %v201_v7  ;;  %v203_v12 = vld [vmem:[#allocation2 + $0x20] sm:$0xff]  ;;  %v205_v16 = vld [vmem:[#allocation2 + $0x30] sm:$0xff]  ;;  %s1105_s24 = scalar_lea.vmem %s629_s18, 384  ;;  %p1110_p5 = scmp.lt.s32.totalorder %s629_s18, %s629_s18 }
  0x4d   :  { %910 = vmatpush3.bf16.msra.mxu0 %v909_v4  ;;  %v95_v14 = vld [vmem:[%s1390_s0 + $0x8] sm:$0xff]  ;;  %v918_v15 = vpack.c.bf16 %v204_v13, %v203_v12  ;;  %v206_v17 = vld [vmem:[#allocation2 + $0x38] sm:$0xff]  ;;  %v96_v18 = vld [vmem:[%s1390_s0 + $0x10] sm:$0xff]  ;;  %p1106_p4 = scmp.ne.s32.totalorder %s629_s18, %s1105_s24  ;;  %p1111_p6 = scmp.lt.s32.totalorder %s1105_s24, %s1105_s24 }
  0x4e   :  { %935 = vmatprep.subr.bf16.mxu0 %v1141_v0  ;;  %913 = vmatpush3.bf16.msra.mxu1 %v912_v10  ;;  %v921_v19 = vpack.c.bf16 %v206_v17, %v205_v16  ;;  %v207_v20 = vld [vmem:[#allocation2 + $0x40] sm:$0xff]  ;;  %v208_v21 = vld [vmem:[#allocation2 + $0x48] sm:$0xff]  ;;  %v209_v23 = vld [vmem:[#allocation2 + $0x50] sm:$0xff] }
  0x4f   :  { %914 = vmatprep.subr.bf16.mxu1 %v1141_v0  ;;  %v924_v22 = vpack.c.bf16 %v208_v21, %v207_v20  ;;  %v210_v24 = vld [vmem:[#allocation2 + $0x58] sm:$0xff]  ;;  %v211_v26 = vld [vmem:[#allocation2 + $0x60] sm:$0xff]  ;;  %v212_v27 = vld [vmem:[#allocation2 + $0x68] sm:$0xff]  ;;  %p1112_p7 = por %p1111_p6, %p1110_p5 }
  0x50   :  { %736 = vmatmul.mubr.msk.f32.vlgmr.msra.gmra.mrb[0].mxu0 %vm106_vm1, %v94_v9  ;;  %v927_v25 = vpack.c.bf16 %v210_v24, %v209_v23  ;;  %v930_v28 = vpack.c.bf16 %v212_v27, %v211_v26  ;;  %v213_v29 = vld [vmem:[#allocation2 + $0x70] sm:$0xff]  ;;  %v214_v30 = vld [vmem:[#allocation2 + $0x78] sm:$0xff]  ;;  %v305_v32 = vld [vmem:[#allocation5] sm:$0xff] }
  0x51   :  { %738 = vmatprep.mubr.msk.f32.mxu0 %vm1142_vm0, %v1143_v1  ;;  %v933_v31 = vpack.c.bf16 %v214_v30, %v213_v29  ;;  %v306_v33 = vld [vmem:[#allocation5 + $0x8] sm:$0xff]  ;;  %v307_v34 = vld [vmem:[#allocation5 + $0x10] sm:$0xff]  ;;  %v308_v36 = vld [vmem:[#allocation5 + $0x18] sm:$0xff]  ;;  %p1113_p8 = pnand %p1112_p7, %p1106_p4 }
  0x52   :  { %916 = vmatpush3.bf16.msra.mxu1 %v915_v11  ;;  %v936_v35 = vpack.c.bf16 %v306_v33, %v305_v32  ;;  %v939_v37 = vpack.c.bf16 %v308_v36, %v307_v34  ;;  %v309_v38 = vld [vmem:[#allocation5 + $0x20] sm:$0xff]  ;;  %v310_v39 = vld [vmem:[#allocation5 + $0x28] sm:$0xff]  ;;  %v311_v41 = vld [vmem:[#allocation5 + $0x30] sm:$0xff] }
  0x53   :  { %917 = vmatprep.subr.bf16.mxu1 %v1141_v0  ;;  %v942_v40 = vpack.c.bf16 %v310_v39, %v309_v38  ;;  %v312_v42 = vld [vmem:[#allocation5 + $0x38] sm:$0xff]  ;;  %v313_v44 = vld [vmem:[#allocation5 + $0x40] sm:$0xff]  ;;  %v314_v45 = vld [vmem:[#allocation5 + $0x48] sm:$0xff] }
  0x54   :  { %739 = vmatmul.mubr.msk.f32.gmra.mrb[2].mxu0 %vm106_vm1, %v95_v14  ;;  %v945_v43 = vpack.c.bf16 %v312_v42, %v311_v41  ;;  %v948_v46 = vpack.c.bf16 %v314_v45, %v313_v44  ;;  %v315_v47 = vld [vmem:[#allocation5 + $0x50] sm:$0xff]  ;;  %v316_v48 = vld [vmem:[#allocation5 + $0x58] sm:$0xff]  ;;  %v317_v50 = vld [vmem:[#allocation5 + $0x60] sm:$0xff] }
  0x55   :  { %741 = vmatprep.mubr.msk.f32.mxu0 %vm1142_vm0, %v1143_v1  ;;  %937 = vmatpush3.bf16.msra.mxu0 %v936_v35  ;;  %v951_v49 = vpack.c.bf16 %v316_v48, %v315_v47  ;;  %v318_v51 = vld [vmem:[#allocation5 + $0x68] sm:$0xff]  ;;  %v642_v53 = vld [vmem:[%s1392_s2] ss:$0 sm:$0xff]  ;;  %v319_v4 = vld [vmem:[#allocation5 + $0x70] sm:$0xff] }
  0x56   :  { %919 = vmatpush3.bf16.msra.mxu1 %v918_v15  ;;  %938 = vmatprep.subr.bf16.mxu0 %v1141_v0  ;;  %v954_v52 = vpack.c.bf16 %v318_v51, %v317_v50  ;;  %v320_v5 = vld [vmem:[#allocation5 + $0x78] sm:$0xff]  ;;  %v411_v7 = vld [vmem:[#allocation7] sm:$0xff]  ;;  %v412_v8 = vld [vmem:[#allocation7 + $0x8] sm:$0xff] }
  0x57   :  { %920 = vmatprep.subr.bf16.mxu1 %v1141_v0  ;;  %v957_v6 = vpack.c.bf16 %v320_v5, %v319_v4  ;;  %v413_v9 = vld [vmem:[#allocation7 + $0x10] sm:$0xff]  ;;  %v960_v10 = vpack.c.bf16 %v412_v8, %v411_v7  ;;  %v414_v11 = vld [vmem:[#allocation7 + $0x18] sm:$0xff]  ;;  %v415_v13 = vld [vmem:[#allocation7 + $0x20] sm:$0xff] }
  0x58   :  { %742 = vmatmul.mubr.msk.f32.gmra.mrb[4].mxu0 %vm106_vm1, %v96_v18  ;;  %v963_v12 = vpack.c.bf16 %v414_v11, %v413_v9  ;;  %v416_v14 = vld [vmem:[#allocation7 + $0x28] sm:$0xff]  ;;  %v417_v16 = vld [vmem:[#allocation7 + $0x30] sm:$0xff]  ;;  %v418_v17 = vld [vmem:[#allocation7 + $0x38] sm:$0xff] }
  0x59   :  { %817 = vmatprep.mubr.msk.f32.mxu0 %vm1142_vm0, %v1143_v1  ;;  %940 = vmatpush3.bf16.msra.mxu0 %v939_v37  ;;  %v966_v15 = vpack.c.bf16 %v416_v14, %v415_v13  ;;  %v969_v18 = vpack.c.bf16 %v418_v17, %v417_v16  ;;  %v420_v20 = vld [vmem:[#allocation7 + $0x48] sm:$0xff]  ;;  %v422_v23 = vld [vmem:[#allocation7 + $0x58] sm:$0xff]  ;;  %v425_v41 = vld [vmem:[#allocation7 + $0x70] sm:$0xff] }
  0x5a   :  { %922 = vmatpush3.bf16.msra.mxu1 %v921_v19  ;;  %941 = vmatprep.subr.bf16.mxu0 %v1141_v0  ;;  %v419_v19 = vld [vmem:[#allocation7 + $0x40] sm:$0xff]  ;;  %v424_v26 = vld [vmem:[#allocation7 + $0x68] sm:$0xff]  ;;  %v426_v42 = vld [vmem:[#allocation7 + $0x78] sm:$0xff] }
  0x5b   :  { %923 = vmatprep.subr.bf16.mxu1 %v1141_v0  ;;  %v972_v21 = vpack.c.bf16 %v420_v20, %v419_v19  ;;  %v517_v44 = vld [vmem:[#allocation8] sm:$0xff]  ;;  %v518_v45 = vld [vmem:[#allocation8 + $0x8] sm:$0xff]  ;;  %v520_v48 = vld [vmem:[#allocation8 + $0x18] sm:$0xff] }
  0x5c   :  { %v984_v47 = vpack.c.bf16 %v518_v45, %v517_v44  ;;  %v521_v50 = vld [vmem:[#allocation8 + $0x20] sm:$0xff]  ;;  %v522_v51 = vld [vmem:[#allocation8 + $0x28] sm:$0xff]  ;;  %v532_v16 = vld [vmem:[#allocation8 + $0x78] sm:$0xff] }
  0x5d   :  { %943 = vmatpush3.bf16.msra.mxu0 %v942_v40 }
  0x5e   :  { %925 = vmatpush3.bf16.msra.mxu1 %v924_v22  ;;  %944 = vmatprep.subr.bf16.mxu0 %v1141_v0  ;;  %v421_v22 = vld [vmem:[#allocation7 + $0x50] sm:$0xff] }
  0x5f   :  { %926 = vmatprep.subr.bf16.mxu1 %v1141_v0  ;;  %v975_v24 = vpack.c.bf16 %v422_v23, %v421_v22 }
  0x61   :  { %946 = vmatpush3.bf16.msra.mxu0 %v945_v43  ;;  %v981_v43 = vpack.c.bf16 %v426_v42, %v425_v41 }
  0x62   :  { %928 = vmatpush3.bf16.msra.mxu1 %v927_v25  ;;  %947 = vmatprep.subr.bf16.mxu0 %v1141_v0  ;;  %v423_v25 = vld [vmem:[#allocation7 + $0x60] sm:$0xff] }
  0x63   :  { %929 = vmatprep.subr.bf16.mxu1 %v1141_v0  ;;  %v978_v27 = vpack.c.bf16 %v424_v26, %v423_v25 }
  0x65   :  { %949 = vmatpush3.bf16.msra.mxu0 %v948_v46  ;;  %v519_v46 = vld [vmem:[#allocation8 + $0x10] sm:$0xff] }
  0x66   :  { %931 = vmatpush3.bf16.msra.mxu1 %v930_v28  ;;  %950 = vmatprep.subr.bf16.mxu0 %v1141_v0  ;;  %v646_v28 = vld [vmem:[%s1394_s4] ss:$0 sm:$0xff] }
  0x67   :  { %932 = vmatprep.subr.bf16.mxu1 %v1141_v0 }
  0x69   :  { %952 = vmatpush3.bf16.msra.mxu0 %v951_v49  ;;  %v987_v49 = vpack.c.bf16 %v520_v48, %v519_v46 }
  0x6a   :  { %934 = vmatpush3.bf16.msra.mxu1 %v933_v31  ;;  %953 = vmatprep.subr.bf16.mxu0 %v1141_v0 }
  0x6b   :  { %959 = vmatprep.subr.bf16.mxu1 %v1141_v0 }
  0x6d   :  { %955 = vmatpush3.bf16.msra.mxu0 %v954_v52  ;;  %v990_v52 = vpack.c.bf16 %v522_v51, %v521_v50 }
  0x6e   :  { %956 = vmatprep.subr.bf16.mxu0 %v1141_v0 }
  0x71   :  { %958 = vmatpush3.bf16.msra.mxu0 %v957_v6 }
  0x72   :  { %983 = vmatprep.subr.bf16.mxu0 %v1141_v0 }
 0x123   :  { %v182_v54 = vpop.f32.mrb[0].mxu0 }
 0x124   :  { %v183_v55 = vadd.f32 %v642_v53, %v182_v54  ;;  %v737_v56 = vpop.f32.mrb[1].mxu0  ;;  %v524_v54 = vld [vmem:[#allocation8 + $0x38] sm:$0xff] }
 0x125   :  { %v525_v56 = vld [vmem:[#allocation8 + $0x40] sm:$0xff] }
 0x126   :  { %v196_v57 = vmax.f32 %v183_v55, 0.0 }
 0x127   :  { %v187_v58 = vpop.f32.mrb[2].mxu0 }
 0x128   :  { %v188_v59 = vadd.f32 %v642_v53, %v187_v58  ;;  %v740_v60 = vpop.f32.mrb[3].mxu0  ;;  %777 = vmatmul.mubr.f32.vlgmr.msra.gmra.mrb[0].mxu1 %v196_v57  ;;  %v526_v57 = vld [vmem:[#allocation8 + $0x48] sm:$0xff] }
 0x129   :  { %779 = vmatprep.mubr.msk.f32.mxu1 %vm1142_vm0, %v1143_v1  ;;  %961 = vmatpush3.bf16.msra.mxu1 %v960_v10  ;;  %v996_v58 = vpack.c.bf16 %v526_v57, %v525_v56  ;;  %v528_v60 = vld [vmem:[#allocation8 + $0x58] sm:$0xff] }
 0x12a   :  { %v197_v61 = vmax.f32 %v188_v59, 0.0  ;;  %962 = vmatprep.subr.bf16.mxu1 %v1141_v0  ;;  %v527_v59 = vld [vmem:[#allocation8 + $0x50] sm:$0xff] }
 0x12b   :  { %v192_v62 = vpop.f32.mrb[4].mxu0 }
 0x12c   :  { %v193_v63 = vadd.f32 %v642_v53, %v192_v62  ;;  %v743_v2 = vpop.f32.mrb[5].mxu0  ;;  %780 = vmatmul.mubr.f32.gmra.mrb[2].mxu1 %v197_v61  ;;  %v523_v53 = vld [vmem:[#allocation8 + $0x30] sm:$0xff]  ;;  %v999_v61 = vpack.c.bf16 %v528_v60, %v527_v59  ;;  %v529_v62 = vld [vmem:[#allocation8 + $0x60] sm:$0xff] }
 0x12d   :  { %782 = vmatprep.mubr.msk.f32.mxu1 %vm1142_vm0, %v1143_v1  ;;  %964 = vmatpush3.bf16.msra.mxu1 %v963_v12  ;;  %v993_v55 = vpack.c.bf16 %v524_v54, %v523_v53 }
 0x12e   :  { %v198_v3 = vmax.f32 %v193_v63, 0.0  ;;  %965 = vmatprep.subr.bf16.mxu1 %v1141_v0  ;;  %v530_v63 = vld [vmem:[#allocation8 + $0x68] sm:$0xff] }
 0x12f   :  { %v1002_v2 = vpack.c.bf16 %v530_v63, %v529_v62 }
 0x130   :  { %783 = vmatmul.mubr.f32.gmra.mrb[4].mxu1 %v198_v3  ;;  %v647_v3 = vld [vmem:[%s1396_s6] ss:$0 sm:$0xff] }
 0x131   :  { %858 = vmatprep.mubr.msk.f32.mxu1 %vm1142_vm0, %v1143_v1  ;;  %967 = vmatpush3.bf16.msra.mxu1 %v966_v15  ;;  %v531_v15 = vld [vmem:[#allocation8 + $0x70] sm:$0xff] }
 0x132   :  { %968 = vmatprep.subr.bf16.mxu1 %v1141_v0  ;;  %v1005_v17 = vpack.c.bf16 %v532_v16, %v531_v15 }
 0x135   :  { %970 = vmatpush3.bf16.msra.mxu1 %v969_v18  ;;  %v648_v18 = vld [vmem:[%s1398_s8] ss:$0 sm:$0xff] }
 0x136   :  { %971 = vmatprep.subr.bf16.mxu1 %v1141_v0 }
 0x139   :  { %973 = vmatpush3.bf16.msra.mxu1 %v972_v21 }
 0x13a   :  { %974 = vmatprep.subr.bf16.mxu1 %v1141_v0 }
 0x13d   :  { %976 = vmatpush3.bf16.msra.mxu1 %v975_v24 }
 0x13e   :  { %977 = vmatprep.subr.bf16.mxu1 %v1141_v0 }
 0x141   :  { %979 = vmatpush3.bf16.msra.mxu1 %v978_v27 }
 0x142   :  { %980 = vmatprep.subr.bf16.mxu1 %v1141_v0 }
 0x145   :  { %982 = vmatpush3.bf16.msra.mxu1 %v981_v43 }
 0x1fb   :  { %v288_v29 = vpop.f32.mrb[0].mxu1 }
 0x1fc   :  { %v289_v30 = vadd.f32 %v646_v28, %v288_v29  ;;  %v778_v31 = vpop.f32.mrb[1].mxu1 }
 0x1fd   :  { %v649_v31 = vld [vmem:[%s1400_s10] ss:$0 sm:$0xff] }
 0x1fe   :  { %v302_v32 = vmax.f32 %v289_v30, 0.0 }
 0x1ff   :  { %v293_v33 = vpop.f32.mrb[2].mxu1 }
 0x200   :  { %v294_v34 = vadd.f32 %v646_v28, %v293_v33  ;;  %v781_v35 = vpop.f32.mrb[3].mxu1  ;;  %818 = vmatmul.mubr.f32.vlgmr.msra.gmra.mrb[6].mxu0 %v302_v32 }
 0x201   :  { %820 = vmatprep.mubr.msk.f32.mxu0 %vm1142_vm0, %v1143_v1  ;;  %985 = vmatpush3.bf16.msra.mxu0 %v984_v47 }
 0x202   :  { %v303_v36 = vmax.f32 %v294_v34, 0.0  ;;  %986 = vmatprep.subr.bf16.mxu0 %v1141_v0 }
 0x203   :  { %v298_v37 = vpop.f32.mrb[4].mxu1 }
 0x204   :  { %v299_v38 = vadd.f32 %v646_v28, %v298_v37  ;;  %v784_v39 = vpop.f32.mrb[5].mxu1  ;;  %821 = vmatmul.mubr.f32.gmra.mrb[8].mxu0 %v303_v36 }
 0x205   :  { %823 = vmatprep.mubr.msk.f32.mxu0 %vm1142_vm0, %v1143_v1  ;;  %988 = vmatpush3.bf16.msra.mxu0 %v987_v49 }
 0x206   :  { %v304_v40 = vmax.f32 %v299_v38, 0.0  ;;  %989 = vmatprep.subr.bf16.mxu0 %v1141_v0 }
 0x208   :  { %824 = vmatmul.mubr.f32.gmra.mrb[10].mxu0 %v304_v40 }
 0x209   :  { %899 = vmatprep.mubr.msk.f32.mxu0 %vm1142_vm0, %v1143_v1  ;;  %991 = vmatpush3.bf16.msra.mxu0 %v990_v52 }
 0x20a   :  { %992 = vmatprep.subr.bf16.mxu0 %v1141_v0 }
 0x20d   :  { %994 = vmatpush3.bf16.msra.mxu0 %v993_v55 }
 0x20e   :  { %995 = vmatprep.subr.bf16.mxu0 %v1141_v0 }
 0x211   :  { %997 = vmatpush3.bf16.msra.mxu0 %v996_v58 }
 0x212   :  { %998 = vmatprep.subr.bf16.mxu0 %v1141_v0 }
 0x215   :  { %1000 = vmatpush3.bf16.msra.mxu0 %v999_v61 }
 0x216   :  { %1001 = vmatprep.subr.bf16.mxu0 %v1141_v0 }
 0x219   :  { %1003 = vmatpush3.bf16.msra.mxu0 %v1002_v2 }
 0x21a   :  { %1004 = vmatprep.subr.bf16.mxu0 %v1141_v0 }
 0x21d   :  { %1006 = vmatpush3.bf16.msra.mxu0 %v1005_v17 }
 0x2d3   :  { %v394_v4 = vpop.f32.mrb[6].mxu0 }
 0x2d4   :  { %v395_v5 = vadd.f32 %v647_v3, %v394_v4  ;;  %v819_v6 = vpop.f32.mrb[7].mxu0 }
 0x2d6   :  { %v408_v7 = vmax.f32 %v395_v5, 0.0 }
 0x2d7   :  { %v399_v8 = vpop.f32.mrb[8].mxu0 }
 0x2d8   :  { %v400_v9 = vadd.f32 %v647_v3, %v399_v8  ;;  %v822_v10 = vpop.f32.mrb[9].mxu0  ;;  %859 = vmatmul.mubr.f32.vlgmr.msra.gmra.mrb[6].mxu1 %v408_v7 }
 0x2d9   :  { %861 = vmatprep.mubr.msk.f32.mxu1 %vm1142_vm0, %v1143_v1 }
 0x2da   :  { %v409_v11 = vmax.f32 %v400_v9, 0.0 }
 0x2db   :  { %v404_v12 = vpop.f32.mrb[10].mxu0 }
 0x2dc   :  { %v405_v13 = vadd.f32 %v647_v3, %v404_v12  ;;  %v825_v14 = vpop.f32.mrb[11].mxu0  ;;  %862 = vmatmul.mubr.f32.gmra.mrb[8].mxu1 %v409_v11 }
 0x2dd   :  { %864 = vmatprep.mubr.msk.f32.mxu1 %vm1142_vm0, %v1143_v1 }
 0x2de   :  { %v410_v0 = vmax.f32 %v405_v13, 0.0 }
 0x2e0   :  { %865 = vmatmul.mubr.f32.gmra.mrb[10].mxu1 %v410_v0 }
 0x3ab   :  { %v500_v19 = vpop.f32.mrb[6].mxu1 }
 0x3ac   :  { %v501_v20 = vadd.f32 %v648_v18, %v500_v19  ;;  %v860_v21 = vpop.f32.mrb[7].mxu1 }
 0x3ae   :  { %v514_v22 = vmax.f32 %v501_v20, 0.0 }
 0x3af   :  { %v505_v23 = vpop.f32.mrb[8].mxu1 }
 0x3b0   :  { %v506_v24 = vadd.f32 %v648_v18, %v505_v23  ;;  %v863_v25 = vpop.f32.mrb[9].mxu1  ;;  %900 = vmatmul.mubr.f32.vlgmr.msra.gmra.mrb[12].mxu0 %v514_v22 }
 0x3b1   :  { %902 = vmatprep.mubr.msk.f32.mxu0 %vm1142_vm0, %v1143_v1 }
 0x3b2   :  { %v515_v26 = vmax.f32 %v506_v24, 0.0 }
 0x3b3   :  { %v510_v27 = vpop.f32.mrb[10].mxu1 }
 0x3b4   :  { %v511_v28 = vadd.f32 %v648_v18, %v510_v27  ;;  %v866_v29 = vpop.f32.mrb[11].mxu1  ;;  %903 = vmatmul.mubr.f32.gmra.mrb[14].mxu0 %v515_v26 }
 0x3b5   :  { %905 = vmatprep.mubr.msk.f32.mxu0 %vm1142_vm0, %v1143_v1 }
 0x3b6   :  { %v516_v30 = vmax.f32 %v511_v28, 0.0 }
 0x3b8   :  { %906 = vmatmul.mubr.f32.gmra.mrb[16].mxu0 %v516_v30 }
 0x483   :  { %v606_v32 = vpop.f32.mrb[12].mxu0 }
 0x484   :  { %v607_v33 = vadd.f32 %v649_v31, %v606_v32  ;;  %v901_v34 = vpop.f32.mrb[13].mxu0 }
 0x486   :  { %620 = vst [vmem:[#allocation10] sm:$0xff] %v607_v33 }
 0x487   :  { %v611_v35 = vpop.f32.mrb[14].mxu0 }
 0x488   :  { %v612_v36 = vadd.f32 %v649_v31, %v611_v35  ;;  %v904_v37 = vpop.f32.mrb[15].mxu0 }
 0x48a   :  { %621 = vst [vmem:[#allocation10 + $0x8] sm:$0xff] %v612_v36 }
 0x48b   :  { %v616_v38 = vpop.f32.mrb[16].mxu0 }
 0x48c   :  { %v617_v39 = vadd.f32 %v649_v31, %v616_v38  ;;  %v907_v40 = vpop.f32.mrb[17].mxu0 }
 0x48e   :  { %622 = vst [vmem:[#allocation10 + $0x10] sm:$0xff] %v617_v39 }
 0x48f   :  { %1116 = shalt.err (!%p1113_p8)
}
 0x490   :  { %s1117_s28 = scalar_lea.hbm %s1401_s11, 384 }
 0x491   :  { %p1118_p9 = scmp.ne.s32.totalorder %s1401_s11, %s1117_s28  ;;  %p1121_p10 = scmp.lt.u32.totalorder %s1117_s28, %s1401_s11 }
 0x493   :  { %p1123_p11 = pnand %p1121_p10, %p1118_p9 }
 0x495   :  { %1126 = shalt.err (!%p1123_p11)
}
 0x496   :  { %634 = dma.vmem_to_hbm [thread:$0]  %s629_s18, 384, %s1401_s11, [#allocation4], %s1137_s29, %s1137_s29, %s1138_s30  }
 0x497   :  { %1133 = dma.done.wait [#allocation4], 384  }
 0x498   :  { %1134 = vsyncadd [#allocation4], 4294966912 }
 0x499   :  { %638 = vsyncpa [#allocation3], 1 }
 0x49a   :  { %639 = vsyncpa [#allocation6], 1 }
 0x49b   :  { %640 = vsyncpa [#allocation9], 1 }
 0x49c   :  { %641 = vsyncpa [#allocation4], 1 }

</bundles_post_ra>
